<compile_context>
chip_gen: v5e
topology: v5e:2x2
jax: 0.10.0
libtpu: 0.0.40
codegen_flags: <defaults>
</compile_context>

<pallas_src>
import functools

import jax
import jax.numpy as jnp
from jax import lax
from jax.experimental import pallas as pl
from jax.experimental.pallas import tpu as pltpu

# Contract both minor dims: A @ B^T (the flash-attention q @ k^T pattern).
NT_DIM_NUMBERS = (((1,), (1,)), ((), ()))

_LANE = 128


def topk_router_kernel(x_ref, w1t_ref, b1_ref, w2t_ref, b2_ref,
                       ori_ref, sparse_ref, idx_ref, *, top_k):
    # x tile arrives tokens-on-sublanes (its natural HBM layout); everything it
    # produces below is tokens-on-LANES (lane-dense).
    x = x_ref[...].astype(jnp.float32)                       # (TM, D)

    # hidden = relu(W1 @ x^T + b1)  -> (H2, TM), lane-dense.
    h_t = lax.dot_general(w1t_ref[...], x, NT_DIM_NUMBERS,
                          preferred_element_type=jnp.float32)
    h_t = jnp.maximum(h_t + b1_ref[...], 0.0)

    # logits = W2 @ hidden + b2     -> (E, TM), lane-dense.
    logits_t = jnp.dot(w2t_ref[...], h_t, preferred_element_type=jnp.float32)
    logits_t = logits_t + b2_ref[...]

    e, tm = logits_t.shape
    sub_iota = lax.broadcasted_iota(jnp.int32, (e, tm), 0)   # expert id per sublane
    neg_inf = jnp.float32(-jnp.inf)

    # ---- top-k via iterative argmax over the (small) expert/sublane axis ----
    work = logits_t
    selected = jnp.zeros((e, tm), dtype=jnp.bool_)
    idx_rows = []
    m0 = None                                                # max(logits) from iter 0
    for j in range(top_k):
        m = jnp.max(work, axis=0, keepdims=True)             # (1, TM)
        if j == 0:
            m0 = m                                           # reused by BOTH softmaxes
        is_max = work == m
        # first (lowest-index) occurrence of the max — matches torch.topk order
        idx = jnp.min(jnp.where(is_max, sub_iota, e), axis=0, keepdims=True)
        sel = sub_iota == idx
        selected = jnp.logical_or(selected, sel)
        idx_rows.append(idx)
        if j + 1 < top_k:
            work = jnp.where(sel, neg_inf, work)
    idx_ref[...] = jnp.concatenate(idx_rows, axis=0).astype(jnp.int32)

    # ---- sparse softmax: non-top-k experts are -inf -> exp() == 0 ----
    # max(sparse_logits) == max(logits) == m0, so no fresh reduction needed.
    e_s = jnp.exp(jnp.where(selected, logits_t, neg_inf) - m0)
    sparse_ref[...] = e_s / jnp.sum(e_s, axis=0, keepdims=True)

    # ---- sharpened softmax: softmax(logits / 0.01) == softmax(100 * logits) ----
    # Shift invariance lets us reuse m0; kept in f32 (the *100 amplifies error).
    e_o = jnp.exp((logits_t - m0) * 100.0)
    ori_ref[...] = e_o / jnp.sum(e_o, axis=0, keepdims=True)


def _round_up(a, b):
    return (a + b - 1) // b * b


def topk_router(x, w1, b1, w2, b2, top_k=2, tile_rows=8192):
    """x: [..., D]; w1: [D, 2D]; b1: [2D]; w2: [2D, E]; b2: [E]."""
    orig_shape = x.shape
    d = orig_shape[-1]
    xf = x.reshape(-1, d)                        # native dtype; no f32 cast, no pad
    n = xf.shape[0]
    h2 = w1.shape[1]
    e = w2.shape[1]

    # Token tile: lane-aligned (multiple of 128) when tiled, and >= 2 grid steps
    # whenever n >= 256 so v7x's two TensorCores both get work.  The last
    # partial tile is handled by Pallas' boundary DMA clipping (tokens map to
    # independent lane columns, so stale boundary lanes cannot contaminate
    # valid tokens and out-of-range columns are never written back).
    if n >= 2 * _LANE:
        tm = min(tile_rows, _round_up(pl.cdiv(n, 2), _LANE))
    else:
        tm = n
    num_tiles = pl.cdiv(n, tm)

    # Weights in (out_features, in_features) layout == PyTorch nn.Linear storage.
    w1t = w1.T.astype(jnp.float32)               # (H2, D)
    w2t = w2.T.astype(jnp.float32)               # (E, H2)
    b1c = b1.reshape(h2, 1).astype(jnp.float32)  # column bias, broadcast over lanes
    b2c = b2.reshape(e, 1).astype(jnp.float32)

    kernel = functools.partial(topk_router_kernel, top_k=top_k)
    ori_t, sparse_t, idx_t = pl.pallas_call(
        kernel,
        out_shape=(jax.ShapeDtypeStruct((e, n), jnp.float32),
                   jax.ShapeDtypeStruct((e, n), jnp.float32),
                   jax.ShapeDtypeStruct((top_k, n), jnp.int32)),
        grid=(num_tiles,),
        in_specs=[pl.BlockSpec((tm, d), lambda i: (i, 0)),    # x tiled over tokens
                  pl.BlockSpec((h2, d), lambda i: (0, 0)),    # weights resident in VMEM
                  pl.BlockSpec((h2, 1), lambda i: (0, 0)),
                  pl.BlockSpec((e, h2), lambda i: (0, 0)),
                  pl.BlockSpec((e, 1), lambda i: (0, 0))],
        out_specs=(pl.BlockSpec((e, tm), lambda i: (0, i)),   # lane-dense outputs
                   pl.BlockSpec((e, tm), lambda i: (0, i)),
                   pl.BlockSpec((top_k, tm), lambda i: (0, i))),
        compiler_params=pltpu.CompilerParams(
            # Independent token tiles -> shard across both TCs on v7x.
            dimension_semantics=("parallel",),
            # Plenty of headroom for tm=8192 (few MB) while staying under
            # v7x's 64 MiB physical VMEM; fine on v5e/v6e as well.
            vmem_limit_bytes=48 * 1024 * 1024),
    )(xf, w1t, b1c, w2t, b2c)

    lead = orig_shape[:-1]
    # One wrapper-side transpose back to the module's [..., E] / [..., top_k] layout.
    return (ori_t.T.reshape(*lead, e),
            sparse_t.T.reshape(*lead, e),
            idx_t.T.reshape(*lead, top_k))


def init_params(key, input_dim, num_experts):
    """Deterministic nn.Linear-style init: U(-1/sqrt(fan_in), 1/sqrt(fan_in))."""
    k1, k2, k3, k4 = jax.random.split(key, 4)
    hidden = 2 * input_dim
    bound1 = 1.0 / jnp.sqrt(input_dim)
    bound2 = 1.0 / jnp.sqrt(hidden)
    w1 = jax.random.uniform(k1, (input_dim, hidden), jnp.float32, -bound1, bound1)
    b1 = jax.random.uniform(k2, (hidden,), jnp.float32, -bound1, bound1)
    w2 = jax.random.uniform(k3, (hidden, num_experts), jnp.float32, -bound2, bound2)
    b2 = jax.random.uniform(k4, (num_experts,), jnp.float32, -bound2, bound2)
    return w1, b1, w2, b2


if __name__ == "__main__":
    # Small shapes consistent with the module: batch=2, seq=8, hidden(input_dim)=32,
    # num_experts=8, top_k=2.  (dropout_rate is unused in the reference forward.)
    input_dim, num_experts, top_k = 32, 8, 2
    key = jax.random.PRNGKey(0)
    kx, kp = jax.random.split(key)
    x = jax.random.normal(kx, (2, 8, input_dim), dtype=jnp.float32)
    w1, b1, w2, b2 = init_params(kp, input_dim, num_experts)

    ori_out, router_out, indices = topk_router(x, w1, b1, w2, b2, top_k=top_k)
    jax.block_until_ready((ori_out, router_out, indices))

    def reference(xv):
        logits = jnp.maximum(xv @ w1 + b1, 0.0) @ w2 + b2
        ref_ori = jax.nn.softmax(logits / 0.01, axis=-1)
        _, top_idx = lax.top_k(logits, top_k)
        one_hot = jax.nn.one_hot(top_idx, num_experts, dtype=bool).any(axis=-2)
        ref_sparse = jax.nn.softmax(jnp.where(one_hot, logits, -jnp.inf), axis=-1)
        return ref_ori, ref_sparse, top_idx

    ref_ori, ref_sparse, ref_idx = reference(x)
    assert ori_out.shape == (2, 8, num_experts)
    assert indices.shape == (2, 8, top_k)
    assert jnp.allclose(ori_out, ref_ori, atol=1e-4)
    assert jnp.allclose(router_out, ref_sparse, atol=1e-5)
    assert jnp.array_equal(indices, ref_idx.astype(jnp.int32))

    # Multi-tile + ragged-tail coverage: n = 385 tokens -> tm = 256, 2 grid steps,
    # last tile partial (129 valid rows) -> exercises boundary-clipped DMAs.
    xb = jax.random.normal(kx, (5, 77, input_dim), dtype=jnp.float32)
    ori_b, sp_b, idx_b = topk_router(xb, w1, b1, w2, b2, top_k=top_k)
    jax.block_until_ready((ori_b, sp_b, idx_b))
    rb_ori, rb_sparse, rb_idx = reference(xb)
    assert jnp.allclose(ori_b, rb_ori, atol=1e-4)
    assert jnp.allclose(sp_b, rb_sparse, atol=1e-5)
    assert jnp.array_equal(idx_b, rb_idx.astype(jnp.int32))

    # Small token count that is not a multiple of 8 (single full-array tile).
    xc = jax.random.normal(kx, (3, 7, input_dim), dtype=jnp.float32)
    ori_c, sp_c, idx_c = topk_router(xc, w1, b1, w2, b2, top_k=top_k)
    jax.block_until_ready((ori_c, sp_c, idx_c))
    rc_ori, rc_sparse, rc_idx = reference(xc)
    assert jnp.allclose(ori_c, rc_ori, atol=1e-4)
    assert jnp.allclose(sp_c, rc_sparse, atol=1e-5)
    assert idx_c.shape == (3, 7, top_k)

    print("KERNEL_OK")
</pallas_src>

<mosaic_0001>
module attributes {stable_mosaic.version = 11 : i64} {
  func.func @topk_router_kernel(%arg0: i32, %arg1: memref<16x32xf32, #tpu.memory_space<vmem>>, %arg2: memref<64x32xf32, #tpu.memory_space<vmem>>, %arg3: memref<64x1xf32, #tpu.memory_space<vmem>>, %arg4: memref<8x64xf32, #tpu.memory_space<vmem>>, %arg5: memref<8x1xf32, #tpu.memory_space<vmem>>, %arg6: memref<8x16xf32, #tpu.memory_space<vmem>>, %arg7: memref<8x16xf32, #tpu.memory_space<vmem>>, %arg8: memref<2x16xi32, #tpu.memory_space<vmem>>) attributes {dimension_semantics = [#tpu.dimension_semantics<parallel>], iteration_bounds = array<i64: 1>, scalar_prefetch = 0 : i64, scratch_operands = 0 : i64, tpu.core_type = #tpu.core_type<tc>, window_params = [{transform_indices = @transform_0, window_bounds = array<i64: 16, 32>}, {pipeline_mode = #tpu.pipeline_mode<synchronous>, transform_indices = @transform_1, window_bounds = array<i64: 64, 32>}, {pipeline_mode = #tpu.pipeline_mode<synchronous>, transform_indices = @transform_2, window_bounds = array<i64: 64, 1>}, {pipeline_mode = #tpu.pipeline_mode<synchronous>, transform_indices = @transform_3, window_bounds = array<i64: 8, 64>}, {pipeline_mode = #tpu.pipeline_mode<synchronous>, transform_indices = @transform_4, window_bounds = array<i64: 8, 1>}, {transform_indices = @transform_5, window_bounds = array<i64: 8, 16>}, {transform_indices = @transform_6, window_bounds = array<i64: 8, 16>}, {transform_indices = @transform_7, window_bounds = array<i64: 2, 16>}]} {
    %c0 = arith.constant 0 : index
    %c0_0 = arith.constant 0 : index
    %0 = vector.load %arg1[%c0, %c0_0] : memref<16x32xf32, #tpu.memory_space<vmem>>, vector<16x32xf32>
    %c0_1 = arith.constant 0 : index
    %c0_2 = arith.constant 0 : index
    %1 = vector.load %arg2[%c0_1, %c0_2] : memref<64x32xf32, #tpu.memory_space<vmem>>, vector<64x32xf32>
    %cst = arith.constant dense<0.000000e+00> : vector<64x16xf32>
    %2 = tpu.matmul %1, %0, %cst {dimension_numbers = #tpu.dot_dimension_numbers<[1], [1], [0], [0], [0, 0, 1, 0], [], []>} : vector<64x32xf32>, vector<16x32xf32>, vector<64x16xf32> -> vector<64x16xf32>
    %c0_3 = arith.constant 0 : index
    %c0_4 = arith.constant 0 : index
    %3 = vector.load %arg3[%c0_3, %c0_4] : memref<64x1xf32, #tpu.memory_space<vmem>>, vector<64x1xf32>
    %4 = vector.broadcast %3 : vector<64x1xf32> to vector<64x16xf32>
    %5 = arith.addf %2, %4 : vector<64x16xf32>
    %cst_5 = arith.constant 0.000000e+00 : f32
    %6 = vector.broadcast %cst_5 : f32 to vector<64x16xf32>
    %7 = arith.maximumf %5, %6 : vector<64x16xf32>
    %c0_6 = arith.constant 0 : index
    %c0_7 = arith.constant 0 : index
    %8 = vector.load %arg4[%c0_6, %c0_7] : memref<8x64xf32, #tpu.memory_space<vmem>>, vector<8x64xf32>
    %cst_8 = arith.constant dense<0.000000e+00> : vector<8x16xf32>
    %9 = tpu.matmul %8, %7, %cst_8 {dimension_numbers = #tpu.dot_dimension_numbers<[1], [0], [0], [1], [0, 0, 1, 1], [], []>} : vector<8x64xf32>, vector<64x16xf32>, vector<8x16xf32> -> vector<8x16xf32>
    %c0_9 = arith.constant 0 : index
    %c0_10 = arith.constant 0 : index
    %10 = vector.load %arg5[%c0_9, %c0_10] : memref<8x1xf32, #tpu.memory_space<vmem>>, vector<8x1xf32>
    %11 = vector.broadcast %10 : vector<8x1xf32> to vector<8x16xf32>
    %12 = arith.addf %9, %11 : vector<8x16xf32>
    %13 = tpu.iota {dimensions = array<i32: 0>} : vector<8x16xi32>
    %false = arith.constant false
    %14 = vector.broadcast %false : i1 to vector<8x16xi1>
    %cst_11 = arith.constant dense<0xFF800000> : vector<16xf32>
    %15 = vector.multi_reduction <maximumf>, %12, %cst_11 [0] : vector<8x16xf32> to vector<16xf32>
    %16 = vector.shape_cast %15 : vector<16xf32> to vector<1x16xf32>
    %17 = vector.broadcast %16 : vector<1x16xf32> to vector<8x16xf32>
    %18 = arith.cmpf oeq, %12, %17 : vector<8x16xf32>
    %c8_i32 = arith.constant 8 : i32
    %19 = vector.broadcast %c8_i32 : i32 to vector<8x16xi32>
    %20 = arith.select %18, %13, %19 : vector<8x16xi1>, vector<8x16xi32>
    %cst_12 = arith.constant dense<2147483647> : vector<16xi32>
    %21 = vector.multi_reduction <minsi>, %20, %cst_12 [0] : vector<8x16xi32> to vector<16xi32>
    %22 = vector.shape_cast %21 : vector<16xi32> to vector<1x16xi32>
    %23 = vector.broadcast %22 : vector<1x16xi32> to vector<8x16xi32>
    %24 = arith.cmpi eq, %13, %23 : vector<8x16xi32>
    %25 = arith.ori %14, %24 : vector<8x16xi1>
    %cst_13 = arith.constant 0xFF800000 : f32
    %26 = vector.broadcast %cst_13 : f32 to vector<8x16xf32>
    %27 = arith.select %24, %26, %12 : vector<8x16xi1>, vector<8x16xf32>
    %cst_14 = arith.constant dense<0xFF800000> : vector<16xf32>
    %28 = vector.multi_reduction <maximumf>, %27, %cst_14 [0] : vector<8x16xf32> to vector<16xf32>
    %29 = vector.shape_cast %28 : vector<16xf32> to vector<1x16xf32>
    %30 = vector.broadcast %29 : vector<1x16xf32> to vector<8x16xf32>
    %31 = arith.cmpf oeq, %27, %30 : vector<8x16xf32>
    %c8_i32_15 = arith.constant 8 : i32
    %32 = vector.broadcast %c8_i32_15 : i32 to vector<8x16xi32>
    %33 = arith.select %31, %13, %32 : vector<8x16xi1>, vector<8x16xi32>
    %cst_16 = arith.constant dense<2147483647> : vector<16xi32>
    %34 = vector.multi_reduction <minsi>, %33, %cst_16 [0] : vector<8x16xi32> to vector<16xi32>
    %35 = vector.shape_cast %34 : vector<16xi32> to vector<1x16xi32>
    %36 = vector.broadcast %35 : vector<1x16xi32> to vector<8x16xi32>
    %37 = arith.cmpi eq, %13, %36 : vector<8x16xi32>
    %38 = arith.ori %25, %37 : vector<8x16xi1>
    %39 = tpu.concatenate %22, %35 in 0 : vector<1x16xi32>, vector<1x16xi32> -> vector<2x16xi32>
    %c0_17 = arith.constant 0 : index
    %c0_18 = arith.constant 0 : index
    %40 = vector.load %arg8[%c0_17, %c0_18] : memref<2x16xi32, #tpu.memory_space<vmem>>, vector<2x16xi32>
    tpu.vector_store %arg8[%c0_17, %c0_18], %39 {strides = array<i32>} : memref<2x16xi32, #tpu.memory_space<vmem>>, vector<2x16xi32>,
    %cst_19 = arith.constant 0xFF800000 : f32
    %41 = vector.broadcast %cst_19 : f32 to vector<8x16xf32>
    %42 = arith.select %38, %12, %41 : vector<8x16xi1>, vector<8x16xf32>
    %43 = vector.broadcast %16 : vector<1x16xf32> to vector<8x16xf32>
    %44 = arith.subf %42, %43 : vector<8x16xf32>
    %45 = math.exp %44 : vector<8x16xf32>
    %cst_20 = arith.constant dense<0.000000e+00> : vector<16xf32>
    %46 = vector.multi_reduction <add>, %45, %cst_20 [0] : vector<8x16xf32> to vector<16xf32>
    %47 = vector.shape_cast %46 : vector<16xf32> to vector<1x16xf32>
    %48 = vector.broadcast %47 : vector<1x16xf32> to vector<8x16xf32>
    %49 = arith.divf %45, %48 : vector<8x16xf32>
    %c0_21 = arith.constant 0 : index
    %c0_22 = arith.constant 0 : index
    %50 = vector.load %arg7[%c0_21, %c0_22] : memref<8x16xf32, #tpu.memory_space<vmem>>, vector<8x16xf32>
    tpu.vector_store %arg7[%c0_21, %c0_22], %49 {strides = array<i32>} : memref<8x16xf32, #tpu.memory_space<vmem>>, vector<8x16xf32>,
    %51 = vector.broadcast %16 : vector<1x16xf32> to vector<8x16xf32>
    %52 = arith.subf %12, %51 : vector<8x16xf32>
    %cst_23 = arith.constant 1.000000e+02 : f32
    %53 = vector.broadcast %cst_23 : f32 to vector<8x16xf32>
    %54 = arith.mulf %52, %53 : vector<8x16xf32>
    %55 = math.exp %54 : vector<8x16xf32>
    %cst_24 = arith.constant dense<0.000000e+00> : vector<16xf32>
    %56 = vector.multi_reduction <add>, %55, %cst_24 [0] : vector<8x16xf32> to vector<16xf32>
    %57 = vector.shape_cast %56 : vector<16xf32> to vector<1x16xf32>
    %58 = vector.broadcast %57 : vector<1x16xf32> to vector<8x16xf32>
    %59 = arith.divf %55, %58 : vector<8x16xf32>
    %c0_25 = arith.constant 0 : index
    %c0_26 = arith.constant 0 : index
    %60 = vector.load %arg6[%c0_25, %c0_26] : memref<8x16xf32, #tpu.memory_space<vmem>>, vector<8x16xf32>
    tpu.vector_store %arg6[%c0_25, %c0_26], %59 {strides = array<i32>} : memref<8x16xf32, #tpu.memory_space<vmem>>, vector<8x16xf32>,
    return
  }
  func.func @transform_0(%arg0: i32) -> (i32, i32) {
    %c0_i32 = arith.constant 0 : i32
    %c0_i32_0 = arith.constant 0 : i32
    return %arg0, %c0_i32 : i32, i32
  }
  func.func @transform_1(%arg0: i32) -> (i32, i32) {
    %c0_i32 = arith.constant 0 : i32
    %c0_i32_0 = arith.constant 0 : i32
    %c0_i32_1 = arith.constant 0 : i32
    return %c0_i32, %c0_i32_0 : i32, i32
  }
  func.func @transform_2(%arg0: i32) -> (i32, i32) {
    %c0_i32 = arith.constant 0 : i32
    %c0_i32_0 = arith.constant 0 : i32
    %c0_i32_1 = arith.constant 0 : i32
    return %c0_i32, %c0_i32_0 : i32, i32
  }
  func.func @transform_3(%arg0: i32) -> (i32, i32) {
    %c0_i32 = arith.constant 0 : i32
    %c0_i32_0 = arith.constant 0 : i32
    %c0_i32_1 = arith.constant 0 : i32
    return %c0_i32, %c0_i32_0 : i32, i32
  }
  func.func @transform_4(%arg0: i32) -> (i32, i32) {
    %c0_i32 = arith.constant 0 : i32
    %c0_i32_0 = arith.constant 0 : i32
    %c0_i32_1 = arith.constant 0 : i32
    return %c0_i32, %c0_i32_0 : i32, i32
  }
  func.func @transform_5(%arg0: i32) -> (i32, i32) {
    %c0_i32 = arith.constant 0 : i32
    %c0_i32_0 = arith.constant 0 : i32
    return %c0_i32, %arg0 : i32, i32
  }
  func.func @transform_6(%arg0: i32) -> (i32, i32) {
    %c0_i32 = arith.constant 0 : i32
    %c0_i32_0 = arith.constant 0 : i32
    return %c0_i32, %arg0 : i32, i32
  }
  func.func @transform_7(%arg0: i32) -> (i32, i32) {
    %c0_i32 = arith.constant 0 : i32
    %c0_i32_0 = arith.constant 0 : i32
    return %c0_i32, %arg0 : i32, i32
  }
}

</mosaic_0001>

<bundles_post_ra>
// kernel: tpu_custom_call.1
= control target key start
LH: loop header
LB: loop body
LE: loop exit
PB: predicated region body
PF: predicated region fallthrough
CT: control target
= control target key end

     0   :  { %13 = vsyncpa [#allocation3], 0  ;;  %vm83_vm0 = vcmask 261120   ;;  %v450_v3 = vmov 0   ;;  %s607_s0 = inlined_call_operand.vmem [shape: f32[16,32], index: 0, kind: input, shape index: {}]   ;;  %s608_s1 = inlined_call_operand.vmem [shape: f32[64,32], index: 1, kind: input, shape index: {}]   ;;  %s609_s2 = inlined_call_operand.vmem [shape: f32[64,1], index: 2, kind: input, shape index: {}]   ;;  %s610_s3 = inlined_call_operand.vmem [shape: f32[8,64], index: 3, kind: input, shape index: {}]   ;;  %s611_s4 = inlined_call_operand.vmem [shape: f32[8,1], index: 4, kind: input, shape index: {}]   ;;  %s612_s5 = inlined_call_operand.hbm [shape: f32[8,16], index: 5, kind: output, shape index: {0}]   ;;  %s613_s6 = inlined_call_operand.hbm [shape: f32[8,16], index: 6, kind: output, shape index: {1}]   ;;  %s614_s7 = inlined_call_operand.hbm [shape: s32[2,16], index: 7, kind: output, shape index: {2}]  }
   0x1   :  { %v26_v0 = vld [vmem:[%s607_s0 + $0x8] sm:$0xff]  ;;  %v42_v1 = vld [vmem:[%s609_s2 + $0x38] sm:$0xff]  ;;  %v25_v2 = vld [vmem:[%s607_s0] sm:$0xff]  ;;  %364 = vset.pattern.permute.xlu1 %v450_v3  ;;  %363 = vset.pattern.permute.xlu0 %v450_v3 }
   0x2   :  { %355 = vmatpush.xpose.msk.msra.mxu2 %vm83_vm0, %v26_v0  ;;  %356 = vmatpush.xpose.msk.msra.mxu3 %vm83_vm0, %v26_v0  ;;  %v40_v4 = vld [vmem:[%s609_s2 + $0x28] sm:$0xff]  ;;  %v30_v5 = vld [vmem:[%s608_s1 + $0x18] sm:$0xff]  ;;  %v33_v6 = vld [vmem:[%s608_s1 + $0x30] sm:$0xff] }
   0x3   :  { %344 = vmatpush.xpose.msk.msra.mxu0 %vm83_vm0, %v26_v0  ;;  %70 = vperm.xlu1 %364, %v40_v4   ;;  %v38_v7 = vld [vmem:[%s609_s2 + $0x18] sm:$0xff]  ;;  %v27_v8 = vld [vmem:[%s608_s1] sm:$0xff] }
   0x4   :  { %80 = vperm.xlu0 %363, %v42_v1   ;;  %365 = vset.pattern.permute.xlu2 %v450_v3 }
   0x5   :  { %60 = vperm.xlu2 %365, %v38_v7  }
   0x6   :  { %357 = vmatpush.xpose.msk.msra.mxu2 %vm83_vm0, %v25_v2  ;;  %358 = vmatpush.xpose.msk.msra.mxu3 %vm83_vm0, %v25_v2 }
   0x7   :  { %345 = vmatpush.xpose.msk.msra.mxu0 %vm83_vm0, %v25_v2 }
   0x8   :  { %14 = vsyncpa [#allocation5], 0  ;;  %v39_v9 = vld [vmem:[%s609_s2 + $0x20] sm:$0xff]  ;;  %v41_v10 = vld [vmem:[%s609_s2 + $0x30] sm:$0xff]  ;;  %vm170_vm1 = vcmask 523264   ;;  %vm196_vm2 = vcmask 130048   ;;  %v194_v60 = vlaneseq }
   0x9   :  { %349 = vmatmul.msk.f32.vlgmr.msra.gmra.mxu2 %vm83_vm0, %v30_v5  ;;  %352 = vmatmul.msk.f32.vlgmr.msra.gmra.mxu3 %vm83_vm0, %v33_v6  ;;  %v37_v11 = vld [vmem:[%s609_s2 + $0x10] sm:$0xff]  ;;  %v31_v12 = vld [vmem:[%s608_s1 + $0x20] sm:$0xff]  ;;  %v34_v13 = vld [vmem:[%s608_s1 + $0x38] sm:$0xff]  ;;  %s304_s16 = sshll.u32 %s612_s5, 4  ;;  %vm239_vm15 = vcmask 1040384   ;;  %s452_s5 = smov [#allocation4]   ;;  %s305_s16 = int_to_ptr.hbm [resolvable:$true] %s304_s16 }
   0xa   :  { %346 = vmatmul.msk.f32.vlgmr.msra.gmra.mxu0 %vm83_vm0, %v27_v8  ;;  %v28_v14 = vld [vmem:[%s608_s1 + $0x8] sm:$0xff]  ;;  %v35_v15 = vld [vmem:[%s609_s2] sm:$0xff]  ;;  %v29_v19 = vld [vmem:[%s608_s1 + $0x10] sm:$0xff]  ;;  %v572_v63 = vshrl.u32 %v194_v60, 7  ;;  %s313_s17 = sshll.u32 %s452_s5, 4  ;;  %s315_s20 = sshll.u32 %s613_s6, 4  ;;  %s314_s17 = int_to_ptr.vmem [resolvable:$true] %s313_s17  ;;  %s316_s20 = int_to_ptr.hbm [resolvable:$true] %s315_s20 }
   0xb   :  { %65 = vperm.xlu1 %364, %v39_v9   ;;  %v36_v16 = vld [vmem:[%s609_s2 + $0x8] sm:$0xff]  ;;  %v164_v17 = vld [vmem:[%s611_s4] sm:$0xff]  ;;  %s453_s21 = smov [#allocation6]   ;;  %s326_s25 = sshll.u32 %s614_s7, 4  ;;  %s327_s25 = int_to_ptr.hbm [resolvable:$true] %s326_s25 }
   0xc   :  { %75 = vperm.xlu0 %363, %v41_v10   ;;  %v32_v18 = vld [vmem:[%s608_s1 + $0x28] sm:$0xff]  ;;  %v163_v52 = vld [vmem:[%s610_s3] sm:$0xff]  ;;  %s451_s3 = smov [#allocation2]   ;;  %s324_s22 = sshll.u32 %s453_s21, 4  ;;  %s325_s22 = int_to_ptr.vmem [resolvable:$true] %s324_s22 }
   0xd   :  { %55 = vperm.xlu2 %365, %v37_v11   ;;  %s302_s4 = sshll.u32 %s451_s3, 4  ;;  %s303_s4 = int_to_ptr.vmem [resolvable:$true] %s302_s4 }
  0x11   :  { %350 = vmatmul.msk.f32.gmra.mxu2 %vm83_vm0, %v31_v12  ;;  %353 = vmatmul.msk.f32.gmra.mxu3 %vm83_vm0, %v34_v13 }
  0x12   :  { %347 = vmatmul.msk.f32.gmra.mxu0 %vm83_vm0, %v28_v14 }
  0x13   :  { %45 = vperm.xlu1 %364, %v35_v15  }
  0x14   :  { %50 = vperm.xlu0 %363, %v36_v16  }
  0x15   :  { %167 = vperm.xlu2 %365, %v164_v17  }
  0x19   :  { %351 = vmatmul.msk.f32.gmra.mxu2 %vm83_vm0, %v32_v18 }
  0x1a   :  { %348 = vmatmul.msk.f32.gmra.mxu0 %vm83_vm0, %v29_v19 }
  0x5f   :  { %v61_v31 = vpop.permute.xlu2 %60 }
  0x67   :  { %v56_v41 = vpop.permute.xlu2 %55 }
  0x6f   :  { %v168_v53 = vpop.permute.xlu2 %167 }
  0x75   :  { %v71_v24 = vpop.permute.xlu1 %70 }
  0x76   :  { %v81_v20 = vpop.permute.xlu0 %80 }
  0x7d   :  { %v66_v33 = vpop.permute.xlu1 %65 }
  0x7e   :  { %v76_v25 = vpop.permute.xlu0 %75 }
  0x85   :  { %v46_v45 = vpop.permute.xlu1 %45 }
  0x86   :  { %v51_v42 = vpop.permute.xlu0 %50 }
  0x87   :  { %v131_v21 = vpop.f32.mrf.mxu0 }
  0x88   :  { %v132_v48 = vadd.f32 %v131_v21, %v46_v45 }
  0x8a   :  { %v155_v51 = vmax.f32 %v132_v48, 0.0 }
  0x8c   :  { %v140_v22 = vpop.f32.mrf.mxu2  ;;  %v149_v23 = vpop.f32.mrf.mxu3 }
  0x8d   :  { %v150_v29 = vadd.f32 %v149_v23, %v76_v25  ;;  %v141_v39 = vadd.f32 %v140_v22, %v61_v31 }
  0x8f   :  { %v134_v26 = vpop.f32.mrf.mxu0  ;;  %v161_v34 = vmax.f32 %v150_v29, 0.0  ;;  %v158_v46 = vmax.f32 %v141_v39, 0.0 }
  0x90   :  { %v135_v47 = vadd.f32 %v134_v26, %v51_v42 }
  0x92   :  { %v156_v50 = vmax.f32 %v135_v47, 0.0 }
  0x94   :  { %v143_v27 = vpop.f32.mrf.mxu2  ;;  %v152_v28 = vpop.f32.mrf.mxu3 }
  0x95   :  { %v153_v30 = vadd.f32 %v152_v28, %v81_v20  ;;  %v144_v36 = vadd.f32 %v143_v27, %v66_v33 }
  0x97   :  { %v162_v32 = vmax.f32 %v153_v30, 0.0  ;;  %v137_v38 = vpop.f32.mrf.mxu0  ;;  %v159_v43 = vmax.f32 %v144_v36, 0.0 }
  0x98   :  { %v138_v44 = vadd.f32 %v137_v38, %v56_v41 }
  0x99   :  { %182 = vmatpush.msra.mxu1 %v162_v32 }
  0x9a   :  { %v157_v49 = vmax.f32 %v138_v44, 0.0 }
  0x9b   :  { %183 = vmatpush.msra.mxu1 %v161_v34 }
  0x9c   :  { %v146_v35 = vpop.f32.mrf.mxu2 }
  0x9d   :  { %v147_v37 = vadd.f32 %v146_v35, %v71_v24 }
  0x9f   :  { %v160_v40 = vmax.f32 %v147_v37, 0.0 }
  0xa1   :  { %184 = vmatpush.msra.mxu1 %v160_v40 }
  0xa3   :  { %185 = vmatpush.msra.mxu1 %v159_v43 }
  0xa5   :  { %186 = vmatpush.msra.mxu1 %v158_v46 }
  0xa7   :  { %187 = vmatpush.msra.mxu1 %v157_v49 }
  0xa9   :  { %188 = vmatpush.msra.mxu1 %v156_v50 }
  0xab   :  { %189 = vmatpush.msra.mxu1 %v155_v51 }
  0xac   :  { %354 = vmatmul.msk.f32.vlgmr.msra.gmra.mxu1 %vm170_vm1, %v163_v52  ;;  %vm241_vm1 = vcmask 123904  }
 0x129   :  { %v191_v54 = vpop.f32.mrf.mxu1 }
 0x12a   :  { %v568_v55 = vadd.f32 %v191_v54, %v168_v53 }
 0x12c   :  { %v197_v56 = vsel %vm196_vm2, %v568_v55, -inf }
 0x12d   :  { %v198_v57 = vrot.slane %v197_v56, 4 }
 0x12f   :  { %v199_v58 = vmax.f32 %v197_v56, %v198_v57 }
 0x131   :  { %v200_v59 = vrot.slane %v199_v58, 2 }
 0x133   :  { %v201_v61 = vmax.f32 %v199_v58, %v200_v59 }
 0x135   :  { %v202_v62 = vrot.slane %v201_v61, 1 }
 0x137   :  { %v574_v0 = vmax.f32 %v201_v61, %v202_v62 }
 0x139   :  { %vm204_vm3 = vcmp.eq.f32.partialorder %v568_v55, %v574_v0  ;;  %v270_v1 = vsub.f32 %v568_v55, %v574_v0 }
 0x13a   :  { %v205_v2 = vsel %vm204_vm3, %v572_v63, 8 }
 0x13b   :  { %v206_v3 = vsel %vm196_vm2, %v205_v2, 2147483647  ;;  %v271_v4 = vmul.f32 100.0, %v270_v1 }
 0x13c   :  { %v207_v5 = vrot.slane %v206_v3, 4 }
 0x13d   :  { %v272_v6 = vmul.f32 1.442695, %v271_v4 }
 0x13e   :  { %vm208_vm4 = vcmp.lt.s32.totalorder %v206_v3, %v207_v5 }
 0x13f   :  { %v209_v7 = vsel %vm208_vm4, %v206_v3, %v207_v5  ;;  %366 = vpow2.f32 %v272_v6 }
 0x140   :  { %v210_v8 = vrot.slane %v209_v7, 2 }
 0x142   :  { %vm211_vm5 = vcmp.lt.s32.totalorder %v209_v7, %v210_v8 }
 0x143   :  { %v212_v9 = vsel %vm211_vm5, %v209_v7, %v210_v8 }
 0x144   :  { %v213_v10 = vrot.slane %v212_v9, 1 }
 0x145   :  { %v367_v11 = vpop.eup %366 }
 0x146   :  { %vm214_vm6 = vcmp.lt.s32.totalorder %v212_v9, %v213_v10  ;;  %v274_v12 = vsel %vm196_vm2, %v367_v11, 0.0 }
 0x147   :  { %v215_v13 = vsel %vm214_vm6, %v212_v9, %v213_v10  ;;  %v275_v14 = vrot.slane %v274_v12, 4 }
 0x148   :  { %vm216_vm7 = vcmp.eq.s32.totalorder %v572_v63, %v215_v13 }
 0x149   :  { %v217_v15 = vsel %vm216_vm7, -inf, %v568_v55  ;;  %v276_v16 = vadd.f32 %v275_v14, %v274_v12 }
 0x14a   :  { %v218_v17 = vsel %vm196_vm2, %v217_v15, -inf }
 0x14b   :  { %v219_v18 = vrot.slane %v218_v17, 4  ;;  %v277_v19 = vrot.slane %v276_v16, 2 }
 0x14d   :  { %v220_v20 = vmax.f32 %v218_v17, %v219_v18  ;;  %v278_v21 = vadd.f32 %v277_v19, %v276_v16 }
 0x14f   :  { %v221_v22 = vrot.slane %v220_v20, 2  ;;  %v279_v23 = vrot.slane %v278_v21, 1 }
 0x151   :  { %v222_v24 = vmax.f32 %v220_v20, %v221_v22  ;;  %v280_v25 = vadd.f32 %v279_v23, %v278_v21 }
 0x153   :  { %v223_v26 = vrot.slane %v222_v24, 1  ;;  %368 = vrcp.f32 %v280_v25  ;;  %v292_v35 = vand.u32 2147483648, %v280_v25  ;;  %v290_v38 = vand.u32 2147483647, %v280_v25 }
 0x154   :  { %vm286_vm12 = vweird.f32 %v280_v25 }
 0x155   :  { %v224_v27 = vmax.f32 %v222_v24, %v223_v26  ;;  %v293_v41 = vor.u32 1.1754944e-38, %v292_v35  ;;  %vm291_vm14 = vcmp.eq.f32.partialorder %v290_v38, 8.507059e+37 }
 0x157   :  { %vm225_vm8 = vcmp.eq.f32.partialorder %v217_v15, %v224_v27 }
 0x158   :  { %v226_v28 = vsel %vm225_vm8, %v572_v63, 8 }
 0x159   :  { %v369_v29 = vpop.eup %368  ;;  %v227_v30 = vsel %vm196_vm2, %v226_v28, 2147483647 }
 0x15a   :  { %v228_v31 = vrot.slane %v227_v30, 4  ;;  %v282_v32 = vmul.f32 %v369_v29, %v280_v25  ;;  %vm287_vm10 = vweird.f32 %v369_v29 }
 0x15b   :  { %vm288_vm13 = vmor %vm286_vm12, %vm287_vm10 }
 0x15c   :  { %vm229_vm9 = vcmp.lt.s32.totalorder %v227_v30, %v228_v31  ;;  %v283_v33 = vsub.f32 1.0, %v282_v32 }
 0x15d   :  { %v230_v34 = vsel %vm229_vm9, %v227_v30, %v228_v31 }
 0x15e   :  { %v231_v36 = vrot.slane %v230_v34, 2  ;;  %v284_v37 = vmul.f32 %v369_v29, %v283_v33 }
 0x160   :  { %vm232_vm11 = vcmp.lt.s32.totalorder %v230_v34, %v231_v36  ;;  %v285_v39 = vadd.f32 %v369_v29, %v284_v37 }
 0x161   :  { %v233_v40 = vsel %vm232_vm11, %v230_v34, %v231_v36 }
 0x162   :  { %v234_v42 = vrot.slane %v233_v40, 1  ;;  %v289_v43 = vsel %vm288_vm13, %v369_v29, %v285_v39 }
 0x163   :  { %v294_v44 = vsel %vm291_vm14, %v293_v41, %v289_v43 }
 0x164   :  { %vm235_vm0 = vcmp.lt.s32.totalorder %v233_v40, %v234_v42  ;;  %v295_v45 = vmul.f32 %v367_v11, %v294_v44 }
 0x165   :  { %v236_v46 = vsel %vm235_vm0, %v233_v40, %v234_v42 }
 0x166   :  { %vm237_vm3 = vcmp.eq.s32.totalorder %v572_v63, %v236_v46  ;;  %296 = vst.msk [vmem:[#allocation2] sm:$0xff] %vm196_vm2, %v295_v45  ;;  %v240_v47 = vsel %vm239_vm15, %v215_v13, %v236_v46 }
 0x167   :  { %vm238_vm4 = vmor %vm216_vm7, %vm237_vm3  ;;  %307 = dma.vmem_to_hbm [thread:$0]  %s303_s4, 128, %s305_s16, [#allocation3]   ;;  %242 = vst.msk [vmem:[#allocation6] sm:$0x3] %vm241_vm1, %v240_v47 }
 0x168   :  { %v243_v48 = vsel %vm238_vm4, %v568_v55, -inf }
 0x169   :  { %v244_v49 = vsub.f32 %v243_v48, %v574_v0 }
 0x16b   :  { %v245_v50 = vmul.f32 1.442695, %v244_v49 }
 0x16d   :  { %370 = vpow2.f32 %v245_v50 }
 0x173   :  { %v371_v51 = vpop.eup %370 }
 0x174   :  { %v247_v52 = vsel %vm196_vm2, %v371_v51, 0.0 }
 0x175   :  { %v248_v53 = vrot.slane %v247_v52, 4 }
 0x177   :  { %v249_v54 = vadd.f32 %v248_v53, %v247_v52 }
 0x179   :  { %v250_v56 = vrot.slane %v249_v54, 2 }
 0x17b   :  { %v251_v57 = vadd.f32 %v250_v56, %v249_v54 }
 0x17d   :  { %v252_v58 = vrot.slane %v251_v57, 1 }
 0x17f   :  { %v253_v59 = vadd.f32 %v252_v58, %v251_v57 }
 0x181   :  { %372 = vrcp.f32 %v253_v59  ;;  %v265_v63 = vand.u32 2147483648, %v253_v59  ;;  %v263_v55 = vand.u32 2147483647, %v253_v59  ;;  %vm259_vm6 = vweird.f32 %v253_v59 }
 0x183   :  { %v266_v2 = vor.u32 1.1754944e-38, %v265_v63  ;;  %vm264_vm8 = vcmp.eq.f32.partialorder %v263_v55, 8.507059e+37 }
 0x187   :  { %v373_v60 = vpop.eup %372 }
 0x188   :  { %v255_v61 = vmul.f32 %v373_v60, %v253_v59  ;;  %vm260_vm5 = vweird.f32 %v373_v60 }
 0x189   :  { %vm261_vm7 = vmor %vm259_vm6, %vm260_vm5 }
 0x18a   :  { %v256_v62 = vsub.f32 1.0, %v255_v61 }
 0x18c   :  { %v257_v1 = vmul.f32 %v373_v60, %v256_v62 }
 0x18e   :  { %v258_v0 = vadd.f32 %v373_v60, %v257_v1 }
 0x190   :  { %v262_v3 = vsel %vm261_vm7, %v373_v60, %v258_v0 }
 0x191   :  { %v267_v4 = vsel %vm264_vm8, %v266_v2, %v262_v3 }
 0x192   :  { %v268_v5 = vmul.f32 %v371_v51, %v267_v4 }
 0x194   :  { %269 = vst.msk [vmem:[#allocation4] sm:$0xff] %vm196_vm2, %v268_v5 }
 0x195   :  { %318 = dma.vmem_to_hbm [thread:$0]  %s314_s17, 128, %s316_s20, [#allocation5]  }
 0x196   :  { %329 = dma.vmem_to_hbm [thread:$0]  %s325_s22, 32, %s327_s25, [#allocation5]  }
 0x197   :  { %446 = dma.done.wait [#allocation3], 128  }
 0x198   :  { %447 = vsyncadd [#allocation3], 4294967168 }
 0x199   :  { %448 = dma.done.wait [#allocation5], 160  }
 0x19a   :  { %449 = vsyncadd [#allocation5], 4294967136 }
 0x19b   :  { %342 = vsyncpa [#allocation3], 1 }
 0x19c   :  { %343 = vsyncpa [#allocation5], 1 }

</bundles_post_ra>
